<compile_context>
chip_gen: v7x
topology: tpu7x:2x2x1
jax: 0.10.0
libtpu: 0.0.40
codegen_flags: <defaults>
</compile_context>

<pallas_src>
import jax
import jax.numpy as jnp
from jax.experimental import pallas as pl
from jax.experimental.pallas import tpu as pltpu


# ----------------------------------------------------------------------------
# generation-aware sizing helpers
# ----------------------------------------------------------------------------
def _vmem_capacity_bytes():
    try:
        return int(pltpu.get_tpu_info().vmem_capacity_bytes)
    except Exception:
        return 64 << 20  # v7x-safe fallback


def _out_block_budget_bytes():
    # ~16 MiB double-buffered output block on 128 MiB parts (v5e/v6e),
    # ~8 MiB on 64 MiB parts (v7x).
    return (16 << 20) if _vmem_capacity_bytes() >= (96 << 20) else (8 << 20)


def _compiler_params(resident_bytes, per_step_bytes, semantics):
    """vmem_limit_bytes from the actual footprint: resident slabs (counted x2
    to be safe) + double-buffered per-step blocks + slack, capped below the
    physical VMEM of the current generation."""
    cap = _vmem_capacity_bytes()
    limit = 2 * int(resident_bytes) + 2 * int(per_step_bytes) + (4 << 20)
    limit = max(limit, 16 << 20)
    limit = min(limit, cap - (4 << 20))
    return pltpu.CompilerParams(
        dimension_semantics=semantics, vmem_limit_bytes=int(limit))


def _choose_batch_tile(B, row_bytes, budget_bytes):
    """Largest Bt that (a) divides B, (b) is a multiple of 8 or equals B (TPU
    sublane rule on the block's second-to-last dim), (c) keeps the
    double-buffered output block under budget, (d) keeps >= 2 grid steps when
    possible (megacore / both v7x TensorCores)."""
    divisors = [d for d in range(1, B + 1) if B % d == 0]
    valid = [d for d in divisors if d == B or d % 8 == 0]
    good = [d for d in valid
            if 2 * d * row_bytes <= budget_bytes and (B < 2 or d <= max(1, B // 2))]
    if good:
        return max(good)
    return min(valid)


# ----------------------------------------------------------------------------
# 1) LearnedPositionalEmbedding forward: out[b, l, :] = table[l, :]
#    Pure broadcast copy of a resident, pre-cast slab; lane-dense (B, L*D)
#    output layout; zero VPU work in the loop body.
# ----------------------------------------------------------------------------
def _pos_broadcast_kernel(pos_ref, out_ref):
    # pos_ref: (1, L*D) resident VMEM slab (already in the output dtype)
    # out_ref: (Bt, L*D) lane-dense output block
    out_ref[...] = jnp.broadcast_to(pos_ref[...], out_ref.shape)


def learned_positional_embedding(x, embed_table, *, out_dtype=None):
    """x: (B, L) int ids (only the SHAPE is used). embed_table: (P, D).
    Returns (B, L, D) = embed_table[arange(L)] broadcast over batch."""
    B, L = x.shape
    P, D = embed_table.shape
    assert L <= P, "sequence length exceeds max_position_embeddings"
    out_dtype = embed_table.dtype if out_dtype is None else jnp.dtype(out_dtype)

    # Only rows [0, L) are ever used: slice + cast once outside the kernel so
    # only L*D elements are DMA'd and the body has no per-step astype.
    pos_slab = embed_table[:L, :].astype(out_dtype).reshape(1, L * D)

    row_bytes = L * D * jnp.dtype(out_dtype).itemsize
    Bt = _choose_batch_tile(B, row_bytes, _out_block_budget_bytes())
    grid = (B // Bt,)

    out2d = pl.pallas_call(
        _pos_broadcast_kernel,
        out_shape=jax.ShapeDtypeStruct((B, L * D), out_dtype),
        grid_spec=pltpu.PrefetchScalarGridSpec(
            num_scalar_prefetch=0,
            grid=grid,
            in_specs=[pl.BlockSpec((1, L * D), lambda b: (0, 0))],  # resident
            out_specs=pl.BlockSpec((Bt, L * D), lambda b: (b, 0)),
        ),
        compiler_params=_compiler_params(
            resident_bytes=row_bytes,
            per_step_bytes=Bt * row_bytes,
            semantics=("parallel",)),
    )(pos_slab)
    return out2d.reshape(B, L, D)


# ----------------------------------------------------------------------------
# 2a) Fused embedding stage — small-vocab path:
#     resident VMEM table + in-register jnp.take gather (no MXU, no one-hot).
# ----------------------------------------------------------------------------
def _fused_take_kernel(tok_ref, tbl_ref, pos_ref, out_ref):
    # tok_ref: (Bt, L) int32 | tbl_ref: (V, D) resident | pos_ref: (L, D) resident
    # out_ref: (Bt, L, D)  (last two dims equal the full array dims -> legal;
    #          real-model d_model=768 is already a lane-dense multiple of 128)
    Bt, L, D = out_ref.shape
    ids = tok_ref[...].reshape(Bt * L)
    emb = jnp.take(tbl_ref[...], ids, axis=0, mode="clip")   # (Bt*L, D) gather
    emb = emb.reshape(Bt, L, D)                               # leading-dim split only
    out_ref[...] = (emb + pos_ref[...][None, :, :]).astype(out_ref.dtype)


# ----------------------------------------------------------------------------
# 2b) Fused embedding stage — large-vocab path:
#     token table stays in HBM, ids are scalar-prefetched into SMEM, embedding
#     rows are gathered with W in-flight DMAs (ring of DMA semaphores).
# ----------------------------------------------------------------------------
def _fused_dma_gather(tokens, tok_table, pos_rows, out_dtype, *, inflight=8):
    B, L = tokens.shape
    V, D = tok_table.shape
    W = max(1, min(inflight, L))
    ids_flat = tokens.reshape(B * L).astype(jnp.int32)

    def kernel(ids_ref, pos_ref, tok_hbm, out_ref, gbuf, sems):
        b = pl.program_id(0)

        def issue(l, slot):
            pltpu.make_async_copy(
                tok_hbm.at[ids_ref[b * L + l]], gbuf.at[l], sems.at[slot]
            ).start()

        # prime W row-gather DMAs
        @pl.loop(0, W)
        def _(l):
            issue(l, l)

        # retire in order while keeping W gathers in flight
        @pl.loop(0, L)
        def _(l):
            slot = l % W
            pltpu.make_async_copy(
                tok_hbm.at[ids_ref[b * L + l]], gbuf.at[l], sems.at[slot]
            ).wait()

            @pl.when(l + W < L)
            def _():
                issue(l + W, slot)

        out_ref[...] = (gbuf[...] + pos_ref[...])[None, :, :].astype(out_ref.dtype)

    tbl_item = jnp.dtype(tok_table.dtype).itemsize
    resident = L * D * jnp.dtype(pos_rows.dtype).itemsize
    per_step = L * D * (tbl_item + jnp.dtype(out_dtype).itemsize) + 4 * B * L

    return pl.pallas_call(
        kernel,
        out_shape=jax.ShapeDtypeStruct((B, L, D), out_dtype),
        grid_spec=pltpu.PrefetchScalarGridSpec(
            num_scalar_prefetch=1,
            grid=(B,),
            in_specs=[
                pl.BlockSpec((L, D), lambda b, ids: (0, 0)),   # pos slab, resident
                pl.BlockSpec(memory_space=pl.ANY),             # token table stays in HBM
            ],
            out_specs=pl.BlockSpec((1, L, D), lambda b, ids: (b, 0, 0)),
            scratch_shapes=[
                pltpu.VMEM((L, D), tok_table.dtype),           # row-gather landing buffer
                pltpu.SemaphoreType.DMA((W,)),                 # in-flight ring
            ],
        ),
        compiler_params=_compiler_params(resident, per_step, ("parallel",)),
    )(ids_flat, pos_rows, tok_table)


def fused_token_pos_embedding(tokens, tok_table, pos_table, *, out_dtype=None,
                              gather="auto"):
    """embed_tokens(tokens) + embed_positions(tokens): (B, L) -> (B, L, D).
    gather: "auto" | "resident" (small vocab, VMEM take) | "dma" (HBM gather)."""
    B, L = tokens.shape
    V, D = tok_table.shape
    P, D2 = pos_table.shape
    assert D == D2 and L <= P
    out_dtype = tok_table.dtype if out_dtype is None else jnp.dtype(out_dtype)

    tokens = tokens.astype(jnp.int32)
    pos_rows = pos_table[:L, :].astype(tok_table.dtype)  # add in table precision

    tbl_bytes = V * D * jnp.dtype(tok_table.dtype).itemsize
    if gather == "auto":
        # Resident-table path only when the table is a small fraction of VMEM
        # (it would be duplicated on both v7x TCs under the "parallel" axis).
        gather = "resident" if tbl_bytes <= _vmem_capacity_bytes() // 8 else "dma"

    if gather == "dma":
        return _fused_dma_gather(tokens, tok_table, pos_rows, out_dtype)

    # ---- small-vocab path: resident table + jnp.take ----
    row_bytes = L * D * jnp.dtype(out_dtype).itemsize
    Bt = _choose_batch_tile(B, row_bytes, _out_block_budget_bytes())
    grid = (B // Bt,)
    resident = tbl_bytes + L * D * jnp.dtype(tok_table.dtype).itemsize
    per_step = Bt * (row_bytes + 4 * L)

    return pl.pallas_call(
        _fused_take_kernel,
        out_shape=jax.ShapeDtypeStruct((B, L, D), out_dtype),
        grid_spec=pltpu.PrefetchScalarGridSpec(
            num_scalar_prefetch=0,
            grid=grid,
            in_specs=[
                pl.BlockSpec((Bt, L), lambda b: (b, 0)),    # token ids
                pl.BlockSpec((V, D), lambda b: (0, 0)),     # token table (resident)
                pl.BlockSpec((L, D), lambda b: (0, 0)),     # positional slab (resident)
            ],
            out_specs=pl.BlockSpec((Bt, L, D), lambda b: (b, 0, 0)),
        ),
        compiler_params=_compiler_params(resident, per_step, ("parallel",)),
    )(tokens, tok_table, pos_rows)


# ----------------------------------------------------------------------------
# helpers / test
# ----------------------------------------------------------------------------
def make_embedding_table(num_embeddings, d_model, pad_idx, key):
    """Deterministic init mimicking nn.Embedding(..., padding_idx=pad_idx)."""
    tbl = jax.random.normal(key, (num_embeddings, d_model), dtype=jnp.float32)
    return tbl.at[pad_idx].set(0.0)


if __name__ == "__main__":
    key = jax.random.PRNGKey(0)
    k_tok_tbl, k_pos_tbl, k_x = jax.random.split(key, 3)

    # Small shapes consistent with the module's forward.
    B, L = 2, 8
    vocab_sz, max_positions, d_model, pad_idx = 16, 16, 32, 0

    pos_table = make_embedding_table(max_positions, d_model, pad_idx, k_pos_tbl)
    tok_table = make_embedding_table(vocab_sz, d_model, pad_idx, k_tok_tbl)
    tokens = jax.random.randint(k_x, (B, L), 0, vocab_sz, dtype=jnp.int32)

    pos_ref = jnp.broadcast_to(pos_table[:L][None], (B, L, d_model))
    fused_ref = tok_table[tokens] + pos_table[:L][None]

    # 1) LearnedPositionalEmbedding forward (standalone, f32).
    pos_out = jax.block_until_ready(learned_positional_embedding(tokens, pos_table))
    assert pos_out.shape == (B, L, d_model)
    assert jnp.allclose(pos_out, pos_ref, atol=1e-6), "pos-embed mismatch"

    # 1b) bf16 output variant (halves HBM write traffic at real model scale).
    pos_bf16 = jax.block_until_ready(
        learned_positional_embedding(tokens, pos_table, out_dtype=jnp.bfloat16))
    assert jnp.allclose(pos_bf16.astype(jnp.float32),
                        pos_ref.astype(jnp.bfloat16).astype(jnp.float32),
                        atol=1e-6), "bf16 pos-embed mismatch"

    # 2) Fused embedding stage — resident-table jnp.take path (small vocab).
    fused_res = jax.block_until_ready(
        fused_token_pos_embedding(tokens, tok_table, pos_table, gather="resident"))
    assert fused_res.shape == (B, L, d_model)
    assert jnp.allclose(fused_res, fused_ref, atol=1e-5), "fused (take) mismatch"

    # 3) Fused embedding stage — HBM table + scalar-prefetched ids + DMA row
    #    gather (the path a real 50k-vocab BART table takes; exercised here at
    #    small shape to keep the script self-contained).
    fused_dma = jax.block_until_ready(
        fused_token_pos_embedding(tokens, tok_table, pos_table, gather="dma"))
    assert fused_dma.shape == (B, L, d_model)
    assert jnp.allclose(fused_dma, fused_ref, atol=1e-5), "fused (dma) mismatch"

    print("KERNEL_OK")
</pallas_src>

<mosaic_0001>
module attributes {stable_mosaic.version = 11 : i64} {
  func.func @_pos_broadcast_kernel(%arg0: i32, %arg1: memref<1x256xf32, #tpu.memory_space<vmem>>, %arg2: memref<2x256xf32, #tpu.memory_space<vmem>>) attributes {dimension_semantics = [#tpu.dimension_semantics<parallel>], iteration_bounds = array<i64: 1>, scalar_prefetch = 0 : i64, scratch_operands = 0 : i64, tpu.core_type = #tpu.core_type<tc>, window_params = [{pipeline_mode = #tpu.pipeline_mode<synchronous>, transform_indices = @transform_0, window_bounds = array<i64: 1, 256>}, {transform_indices = @transform_1, window_bounds = array<i64: 2, 256>}]} {
    %c0 = arith.constant 0 : index
    %c0_0 = arith.constant 0 : index
    %0 = vector.load %arg1[%c0, %c0_0] : memref<1x256xf32, #tpu.memory_space<vmem>>, vector<1x256xf32>
    %1 = vector.shape_cast %0 : vector<1x256xf32> to vector<1x256xf32>
    %2 = vector.broadcast %1 : vector<1x256xf32> to vector<2x256xf32>
    %c0_1 = arith.constant 0 : index
    %c0_2 = arith.constant 0 : index
    %3 = vector.load %arg2[%c0_1, %c0_2] : memref<2x256xf32, #tpu.memory_space<vmem>>, vector<2x256xf32>
    tpu.vector_store %arg2[%c0_1, %c0_2], %2 {strides = array<i32>} : memref<2x256xf32, #tpu.memory_space<vmem>>, vector<2x256xf32>,
    return
  }
  func.func @transform_0(%arg0: i32) -> (i32, i32) {
    %c0_i32 = arith.constant 0 : i32
    %c0_i32_0 = arith.constant 0 : i32
    %c0_i32_1 = arith.constant 0 : i32
    return %c0_i32, %c0_i32_0 : i32, i32
  }
  func.func @transform_1(%arg0: i32) -> (i32, i32) {
    %c0_i32 = arith.constant 0 : i32
    %c0_i32_0 = arith.constant 0 : i32
    return %arg0, %c0_i32 : i32, i32
  }
}

</mosaic_0001>

<bundles_post_ra>
// kernel: tpu_custom_call.1
= control target key start
LH: loop header
LB: loop body
LE: loop exit
PB: predicated region body
PF: predicated region fallthrough
CT: control target
= control target key end

     0   :  { %6 = vsyncpa [#allocation3], 0  ;;  %s143_s0 = inlined_call_operand.hbm [shape: f32[1,256], index: 0, kind: input, shape index: {}]   ;;  %s144_s1 = inlined_call_operand.hbm [shape: f32[2,256], index: 1, kind: output, shape index: {}]  }
   0x1   :  { %7 = vsyncpa [#allocation4], 0  ;;  %s107_s6 = smov [#allocation2]   ;;  %s59_s10 = scalar_lea.hbm %s143_s0, 32 }
   0x2   :  { %s14_s7 = sshll.u32 %s107_s6, 4  ;;  %p60_p0 = scmp.ne.s32.totalorder %s143_s0, %s59_s10  ;;  %s15_s7 = int_to_ptr.vmem [resolvable:$true] %s14_s7 }
   0x3   :  { %p63_p1 = scmp.lt.u32.totalorder %s59_s10, %s143_s0 }
   0x5   :  { %p65_p2 = pnand %p63_p1, %p60_p0 }
   0x7   :  { %68 = shalt.err (!%p65_p2)
}
   0x8   :  { %s69_s15 = scalar_lea.vmem %s15_s7, 32  ;;  %p74_p4 = scmp.lt.s32.totalorder %s15_s7, %s15_s7 }
   0x9   :  { %p70_p3 = scmp.ne.s32.totalorder %s15_s7, %s69_s15  ;;  %p75_p5 = scmp.lt.s32.totalorder %s69_s15, %s69_s15 }
   0xb   :  { %p76_p6 = por %p75_p5, %p74_p4 }
   0xd   :  { %p77_p7 = pnand %p76_p6, %p70_p3 }
   0xf   :  { %80 = shalt.err (!%p77_p7)
}
  0x10   :  { %17 = dma.hbm_to_vmem [thread:$0]  %s143_s0, 32, %s15_s7, [#allocation3]  }
  0x11   :  { %103 = dma.done.wait [#allocation3], 32  }
  0x12   :  { %104 = vsyncadd [#allocation3], 4294967264  ;;  %v23_v0 = vlaneseq  ;;  %v21_v4 = vld [vmem:[#allocation2] sm:$0x3]  ;;  %s108_s18 = smov [#allocation5]  }
  0x13   :  { %s47_s19 = sshll.u32 %s108_s18, 4  ;;  %s48_s19 = int_to_ptr.vmem [resolvable:$true] %s47_s19 }
  0x14   :  { %v24_v1 = vshrl.u32 %v23_v0, 7  ;;  %s81_s20 = scalar_lea.vmem %s48_s19, 64  ;;  %p86_p9 = scmp.lt.s32.totalorder %s48_s19, %s48_s19 }
  0x15   :  { %p82_p8 = scmp.ne.s32.totalorder %s48_s19, %s81_s20  ;;  %p87_p10 = scmp.lt.s32.totalorder %s81_s20, %s81_s20 }
  0x16   :  { %v25_v2 = vsub.s32 0, %v24_v1  ;;  %v29_v3 = vsub.s32 1, %v24_v1 }
  0x17   :  { %p88_p11 = por %p87_p10, %p86_p9 }
  0x18   :  { %v26_v5 = vrot.slane %v21_v4, %v25_v2  ;;  %v30_v6 = vrot.slane %v21_v4, %v29_v3 }
  0x19   :  { %p89_p12 = pnand %p88_p11, %p82_p8 }
  0x1a   :  { %v31_v7 = vcombine.low %v26_v5, %v30_v6 }
  0x1c   :  { %56 = vst.sshfl [vmem:[#allocation5] sm:$0x33 pattern:$0x76325410] %v31_v7 }
  0x1d   :  { %92 = shalt.err (!%p89_p12)
}
  0x1e   :  { %s93_s22 = scalar_lea.hbm %s144_s1, 64 }
  0x1f   :  { %p94_p13 = scmp.ne.s32.totalorder %s144_s1, %s93_s22  ;;  %p97_p0 = scmp.lt.u32.totalorder %s93_s22, %s144_s1 }
  0x21   :  { %p99_p1 = pnand %p97_p0, %p94_p13 }
  0x23   :  { %102 = shalt.err (!%p99_p1)
}
  0x24   :  { %50 = dma.vmem_to_hbm [thread:$0]  %s48_s19, 64, %s144_s1, [#allocation4]  }
  0x25   :  { %105 = dma.done.wait [#allocation4], 64  }
  0x26   :  { %106 = vsyncadd [#allocation4], 4294967232 }
  0x27   :  { %54 = vsyncpa [#allocation3], 1 }
  0x28   :  { %55 = vsyncpa [#allocation4], 1 }

</bundles_post_ra>
